<compile_context>
chip_gen: v7x
topology: tpu7x:2x2x1
jax: 0.10.0
libtpu: 0.0.40
codegen_flags: <defaults>
</compile_context>

<pallas_src>
import jax
import jax.numpy as jnp
from jax.experimental import pallas as pl
from jax.experimental.pallas import tpu as pltpu


def _mlp_kernel(xT_ref, w1T_ref, b1_ref, w2_ref, b2_ref, o_ref):
    """Fused polar transform + 2-layer MLP, lane-dense (batch on lanes).

    xT_ref : (2, TB)       f32   rows = [x; y]
    w1T_ref: (n_hid, 2)    f32
    b1_ref : (n_hid, 1)    f32
    w2_ref : (n_hid, 1)    f32
    b2_ref : (1, 1)        f32
    o_ref  : (1, TB)       f32
    """
    xT = xT_ref[...]                       # (2, TB)
    px = xT[0:1, :]                        # (1, TB)
    py = xT[1:2, :]                        # (1, TB)

    # Cartesian -> polar (replaces the Python loop + math.sqrt/atan2 in torch).
    r = jnp.sqrt(px * px + py * py)        # (1, TB)
    theta = jnp.arctan2(py, px)            # (1, TB)

    # Hidden layer: K=2, so two rank-1 broadcasts on the VPU (no MXU).
    w1T = w1T_ref[...]                     # (n_hid, 2)
    h = w1T[:, 0:1] * r + w1T[:, 1:2] * theta + b1_ref[...]   # (n_hid, TB)
    h = jnp.tanh(h)

    # Output layer: N=1 -> broadcast-multiply + sublane reduce (no MXU).
    logits = jnp.sum(w2_ref[...] * h, axis=0, keepdims=True) + b2_ref[...]  # (1, TB)
    o_ref[...] = jax.nn.sigmoid(logits)


def mlp_forward(x, w1, b1, w2, b2, *, tb=1024):
    """x: (B, 2) f32; w1: (2, n_hid); b1: (n_hid,); w2: (n_hid,); b2: ().

    Returns (B, 1) f32. `tb` is the batch tile (lane) width; must be a
    multiple of 128.
    """
    assert tb % 128 == 0, "batch tile must be a multiple of 128 lanes"
    B = x.shape[0]
    n_hid = w1.shape[1]

    # Pad the batch up to a multiple of the tile and put it on the lane axis.
    b_pad = ((B + tb - 1) // tb) * tb
    xT = jnp.pad(x.astype(jnp.float32), ((0, b_pad - B), (0, 0))).T     # (2, b_pad)

    w1T = jnp.asarray(w1, jnp.float32).T                                # (n_hid, 2)
    b1r = jnp.asarray(b1, jnp.float32).reshape(n_hid, 1)                # (n_hid, 1)
    w2r = jnp.asarray(w2, jnp.float32).reshape(n_hid, 1)                # (n_hid, 1)
    b2r = jnp.asarray(b2, jnp.float32).reshape(1, 1)                    # (1, 1)

    grid = (b_pad // tb,)
    param_bytes = 4 * (2 * n_hid + n_hid + n_hid + 1)
    cost = pl.CostEstimate(
        flops=int(b_pad * (6 * n_hid + 8)),
        transcendentals=int(b_pad * (n_hid + 3)),
        bytes_accessed=int(12 * b_pad + param_bytes),
    )

    out = pl.pallas_call(
        _mlp_kernel,
        out_shape=jax.ShapeDtypeStruct((1, b_pad), jnp.float32),
        grid=grid,
        in_specs=[
            pl.BlockSpec((2, tb), lambda i: (0, i)),        # x tile (per step)
            pl.BlockSpec((n_hid, 2), lambda i: (0, 0)),     # weights: resident
            pl.BlockSpec((n_hid, 1), lambda i: (0, 0)),
            pl.BlockSpec((n_hid, 1), lambda i: (0, 0)),
            pl.BlockSpec((1, 1), lambda i: (0, 0)),
        ],
        out_specs=pl.BlockSpec((1, tb), lambda i: (0, i)),  # lane-dense output
        compiler_params=pltpu.CompilerParams(
            dimension_semantics=("parallel",),
        ),
        cost_estimate=cost,
    )(xT, w1T, b1r, w2r, b2r)

    return out[0, :B].reshape(B, 1)


def init_params(key, n_hid):
    """Deterministic init mimicking nn.Linear's default U(-1/sqrt(fan_in), ...)."""
    k1, k2, k3, k4 = jax.random.split(key, 4)
    bound1 = 1.0 / jnp.sqrt(2.0)
    bound2 = 1.0 / jnp.sqrt(float(n_hid))
    w1 = jax.random.uniform(k1, (2, n_hid), jnp.float32, -bound1, bound1)
    b1 = jax.random.uniform(k2, (n_hid,), jnp.float32, -bound1, bound1)
    w2 = jax.random.uniform(k3, (n_hid,), jnp.float32, -bound2, bound2)
    b2 = jax.random.uniform(k4, (), jnp.float32, -bound2, bound2)
    return w1, b1, w2, b2


def _reference(x, w1, b1, w2, b2):
    """Pure-JAX reference (same math, no Pallas)."""
    r = jnp.sqrt(x[:, 0:1] ** 2 + x[:, 1:2] ** 2)
    theta = jnp.arctan2(x[:, 1:2], x[:, 0:1])
    polar = jnp.concatenate([r, theta], axis=1)
    h = jnp.tanh(polar @ w1 + b1[None, :])
    return jax.nn.sigmoid(h @ w2.reshape(-1, 1) + b2)


if __name__ == "__main__":
    key = jax.random.PRNGKey(0)
    k_in, k_par, k_in2 = jax.random.split(key, 3)

    n_hid = 32
    w1, b1, w2, b2 = init_params(k_par, n_hid)

    # Small case (B=8): single grid step, exercises batch padding.
    B = 8
    x = jax.random.normal(k_in, (B, 2), dtype=jnp.float32)
    out = jax.block_until_ready(mlp_forward(x, w1, b1, w2, b2, tb=128))
    ref = _reference(x, w1, b1, w2, b2)
    assert out.shape == (B, 1)
    assert jnp.allclose(out, ref, atol=1e-5, rtol=1e-5)

    # Slightly larger, non-multiple batch: exercises multiple grid steps.
    B2 = 1000
    x2 = jax.random.normal(k_in2, (B2, 2), dtype=jnp.float32)
    out2 = jax.block_until_ready(mlp_forward(x2, w1, b1, w2, b2, tb=256))
    ref2 = _reference(x2, w1, b1, w2, b2)
    assert out2.shape == (B2, 1)
    assert jnp.allclose(out2, ref2, atol=1e-5, rtol=1e-5)

    print("KERNEL_OK")
</pallas_src>

<mosaic_0001>
module attributes {stable_mosaic.version = 11 : i64} {
  func.func @_mlp_kernel(%arg0: i32, %arg1: memref<2x128xf32, #tpu.memory_space<vmem>>, %arg2: memref<32x2xf32, #tpu.memory_space<vmem>>, %arg3: memref<32x1xf32, #tpu.memory_space<vmem>>, %arg4: memref<32x1xf32, #tpu.memory_space<vmem>>, %arg5: memref<1x1xf32, #tpu.memory_space<vmem>>, %arg6: memref<1x128xf32, #tpu.memory_space<vmem>>) attributes {dimension_semantics = [#tpu.dimension_semantics<parallel>], iteration_bounds = array<i64: 1>, scalar_prefetch = 0 : i64, scratch_operands = 0 : i64, tpu.core_type = #tpu.core_type<tc>, window_params = [{transform_indices = @transform_0, window_bounds = array<i64: 2, 128>}, {pipeline_mode = #tpu.pipeline_mode<synchronous>, transform_indices = @transform_1, window_bounds = array<i64: 32, 2>}, {pipeline_mode = #tpu.pipeline_mode<synchronous>, transform_indices = @transform_2, window_bounds = array<i64: 32, 1>}, {pipeline_mode = #tpu.pipeline_mode<synchronous>, transform_indices = @transform_3, window_bounds = array<i64: 32, 1>}, {pipeline_mode = #tpu.pipeline_mode<synchronous>, transform_indices = @transform_4, window_bounds = array<i64: 1, 1>}, {transform_indices = @transform_5, window_bounds = array<i64: 1, 128>}]} {
    %c0 = arith.constant 0 : index
    %c0_0 = arith.constant 0 : index
    %0 = vector.load %arg1[%c0, %c0_0] : memref<2x128xf32, #tpu.memory_space<vmem>>, vector<2x128xf32>
    %1 = vector.extract_strided_slice %0 {offsets = [0, 0], sizes = [1, 128], strides = [1, 1]} : vector<2x128xf32> to vector<1x128xf32>
    %2 = vector.extract_strided_slice %0 {offsets = [1, 0], sizes = [1, 128], strides = [1, 1]} : vector<2x128xf32> to vector<1x128xf32>
    %3 = arith.mulf %1, %1 : vector<1x128xf32>
    %4 = arith.mulf %2, %2 : vector<1x128xf32>
    %5 = arith.addf %3, %4 : vector<1x128xf32>
    %6 = math.sqrt %5 : vector<1x128xf32>
    %7 = math.atan2 %2, %1 : vector<1x128xf32>
    %c0_1 = arith.constant 0 : index
    %c0_2 = arith.constant 0 : index
    %8 = vector.load %arg2[%c0_1, %c0_2] : memref<32x2xf32, #tpu.memory_space<vmem>>, vector<32x2xf32>
    %9 = vector.extract_strided_slice %8 {offsets = [0, 0], sizes = [32, 1], strides = [1, 1]} : vector<32x2xf32> to vector<32x1xf32>
    %10 = vector.broadcast %9 : vector<32x1xf32> to vector<32x128xf32>
    %11 = vector.broadcast %6 : vector<1x128xf32> to vector<32x128xf32>
    %12 = arith.mulf %10, %11 : vector<32x128xf32>
    %13 = vector.extract_strided_slice %8 {offsets = [0, 1], sizes = [32, 1], strides = [1, 1]} : vector<32x2xf32> to vector<32x1xf32>
    %14 = vector.broadcast %13 : vector<32x1xf32> to vector<32x128xf32>
    %15 = vector.broadcast %7 : vector<1x128xf32> to vector<32x128xf32>
    %16 = arith.mulf %14, %15 : vector<32x128xf32>
    %17 = arith.addf %12, %16 : vector<32x128xf32>
    %c0_3 = arith.constant 0 : index
    %c0_4 = arith.constant 0 : index
    %18 = vector.load %arg3[%c0_3, %c0_4] : memref<32x1xf32, #tpu.memory_space<vmem>>, vector<32x1xf32>
    %19 = vector.broadcast %18 : vector<32x1xf32> to vector<32x128xf32>
    %20 = arith.addf %17, %19 : vector<32x128xf32>
    %21 = math.tanh %20 : vector<32x128xf32>
    %c0_5 = arith.constant 0 : index
    %c0_6 = arith.constant 0 : index
    %22 = vector.load %arg4[%c0_5, %c0_6] : memref<32x1xf32, #tpu.memory_space<vmem>>, vector<32x1xf32>
    %23 = vector.broadcast %22 : vector<32x1xf32> to vector<32x128xf32>
    %24 = arith.mulf %23, %21 : vector<32x128xf32>
    %cst = arith.constant dense<0.000000e+00> : vector<128xf32>
    %25 = vector.multi_reduction <add>, %24, %cst [0] : vector<32x128xf32> to vector<128xf32>
    %26 = vector.shape_cast %25 : vector<128xf32> to vector<1x128xf32>
    %c0_7 = arith.constant 0 : index
    %c0_8 = arith.constant 0 : index
    %27 = vector.load %arg5[%c0_7, %c0_8] : memref<1x1xf32, #tpu.memory_space<vmem>>, vector<1x1xf32>
    %28 = vector.broadcast %27 : vector<1x1xf32> to vector<1x128xf32>
    %29 = arith.addf %26, %28 : vector<1x128xf32>
    %30 = arith.negf %29 : vector<1x128xf32>
    %31 = math.exp %30 : vector<1x128xf32>
    %cst_9 = arith.constant 1.000000e+00 : f32
    %32 = vector.broadcast %cst_9 : f32 to vector<1x128xf32>
    %33 = arith.addf %32, %31 : vector<1x128xf32>
    %34 = arith.divf %32, %33 : vector<1x128xf32>
    %c0_10 = arith.constant 0 : index
    %c0_11 = arith.constant 0 : index
    %35 = vector.load %arg6[%c0_10, %c0_11] : memref<1x128xf32, #tpu.memory_space<vmem>>, vector<1x128xf32>
    tpu.vector_store %arg6[%c0_10, %c0_11], %34 {strides = array<i32>} : memref<1x128xf32, #tpu.memory_space<vmem>>, vector<1x128xf32>,
    return
  }
  func.func @transform_0(%arg0: i32) -> (i32, i32) {
    %c0_i32 = arith.constant 0 : i32
    %c0_i32_0 = arith.constant 0 : i32
    return %c0_i32, %arg0 : i32, i32
  }
  func.func @transform_1(%arg0: i32) -> (i32, i32) {
    %c0_i32 = arith.constant 0 : i32
    %c0_i32_0 = arith.constant 0 : i32
    %c0_i32_1 = arith.constant 0 : i32
    return %c0_i32, %c0_i32_0 : i32, i32
  }
  func.func @transform_2(%arg0: i32) -> (i32, i32) {
    %c0_i32 = arith.constant 0 : i32
    %c0_i32_0 = arith.constant 0 : i32
    %c0_i32_1 = arith.constant 0 : i32
    return %c0_i32, %c0_i32_0 : i32, i32
  }
  func.func @transform_3(%arg0: i32) -> (i32, i32) {
    %c0_i32 = arith.constant 0 : i32
    %c0_i32_0 = arith.constant 0 : i32
    %c0_i32_1 = arith.constant 0 : i32
    return %c0_i32, %c0_i32_0 : i32, i32
  }
  func.func @transform_4(%arg0: i32) -> (i32, i32) {
    %c0_i32 = arith.constant 0 : i32
    %c0_i32_0 = arith.constant 0 : i32
    %c0_i32_1 = arith.constant 0 : i32
    return %c0_i32, %c0_i32_0 : i32, i32
  }
  func.func @transform_5(%arg0: i32) -> (i32, i32) {
    %c0_i32 = arith.constant 0 : i32
    %c0_i32_0 = arith.constant 0 : i32
    return %c0_i32, %arg0 : i32, i32
  }
}

</mosaic_0001>

<bundles_post_ra>
// kernel: tpu_custom_call.1
= control target key start
LH: loop header
LB: loop body
LE: loop exit
PB: predicated region body
PF: predicated region fallthrough
CT: control target
= control target key end

     0   :  { %s418_s0 = inlined_call_operand.vmem [shape: f32[2,128], index: 0, kind: input, shape index: {}]   ;;  %s419_s1 = inlined_call_operand.vmem [shape: f32[32,2], index: 1, kind: input, shape index: {}]   ;;  %s420_s2 = inlined_call_operand.vmem [shape: f32[32,1], index: 2, kind: input, shape index: {}]   ;;  %s421_s3 = inlined_call_operand.vmem [shape: f32[32,1], index: 3, kind: input, shape index: {}]   ;;  %s422_s4 = inlined_call_operand.<no memory space> [shape: f32[1,1], index: 4, kind: input, shape index: {}]   ;;  %s423_s5 = inlined_call_operand.hbm [shape: f32[1,128], index: 5, kind: output, shape index: {}]  }
   0x1   :  { %v10_v0 = vstv %s422_s4 }
   0x2   :  { %11 = vst [vmem:[#allocation2] sm:$0x1] %v10_v0 }
   0x3   :  { %v86_v1 = vld [vmem:[%s419_s1] sm:$0xff]  ;;  %v296_v2 = vmov 1   ;;  %v297_v3 = vmov 0   ;;  %v87_v4 = vld [vmem:[%s419_s1 + $0x8] sm:$0xff] }
   0x4   :  { %254 = vset.pattern.permute.xlu1 %v296_v2  ;;  %253 = vset.pattern.permute.xlu0 %v297_v3  ;;  %v343_v5 = vld [vmem:[%s418_s0] sm:$0x3] }
   0x5   :  { %119 = vperm.xlu1 %254, %v86_v1   ;;  %92 = vperm.xlu0 %253, %v86_v1   ;;  %v346_v6 = vrot.slane %v343_v5, 7 }
   0x6   :  { %12 = vsyncpa [#allocation4], 0  ;;  %v88_v7 = vld [vmem:[%s419_s1 + $0x10] sm:$0xff]  ;;  %v355_v9 = vand.u32 2147483647, %v343_v5  ;;  %v89_v10 = vld [vmem:[%s419_s1 + $0x18] sm:$0xff]  ;;  %v24_v42 = vmul.f32 %v343_v5, %v343_v5  ;;  %vm74_vm5 = vcmp.ne.f32.partialorder %v343_v5, %v343_v5  ;;  %v110_v56 = vlaneseq }
   0x7   :  { %v352_v8 = vand.u32 2147483647, %v346_v6  ;;  %v146_v12 = vld [vmem:[%s420_s2] sm:$0xff]  ;;  %v147_v13 = vld [vmem:[%s420_s2 + $0x8] sm:$0xff]  ;;  %v148_v14 = vld [vmem:[%s420_s2 + $0x10] sm:$0xff]  ;;  %vm66_vm1 = vcmp.lt.f32.partialorder %v346_v6, 0.0  ;;  %vm73_vm4 = vcmp.ne.f32.partialorder %v346_v6, %v346_v6 }
   0x8   :  { %v149_v15 = vld [vmem:[%s420_s2 + $0x18] sm:$0xff]  ;;  %v178_v16 = vld [vmem:[%s421_s3] sm:$0xff]  ;;  %v179_v17 = vld [vmem:[%s421_s3 + $0x8] sm:$0xff]  ;;  %v26_v44 = vrot.slane %v24_v42, 1  ;;  %vm69_vm2 = vcmp.lt.s32.totalorder %v346_v6, 0  ;;  %vm71_vm3 = vcmp.eq.f32.partialorder %v343_v5, 0.0 }
   0x9   :  { %123 = vperm.xlu1 %254, %v87_v4   ;;  %97 = vperm.xlu0 %253, %v87_v4   ;;  %v42_v11 = vmax.f32 %v352_v8, %v355_v9  ;;  %v41_v18 = vmin.f32 %v352_v8, %v355_v9  ;;  %v180_v20 = vld [vmem:[%s421_s3 + $0x10] sm:$0xff]  ;;  %v181_v21 = vld [vmem:[%s421_s3 + $0x18] sm:$0xff]  ;;  %v215_v23 = vld [vmem:[#allocation2] sm:$0x1]  ;;  %vm63_vm0 = vcmp.gt.f32.partialorder %v355_v9, %v352_v8  ;;  %v298_v49 = vmov 0.0   ;;  %s300_s3 = smov [#allocation3]  }
   0xa   :  { %v28_v46 = vadd.f32 %v26_v44, %v24_v42  ;;  %v70_v50 = vsel %vm69_vm2, 3.1415927, %v298_v49  ;;  %vm75_vm6 = vmor %vm73_vm4, %vm74_vm5  ;;  %vm79_vm7 = vcmp.eq.s32.totalorder %v352_v8, inf  ;;  %vm80_vm8 = vcmp.eq.s32.totalorder %v355_v9, inf  ;;  %s239_s17 = sshll.u32 %s300_s3, 4  ;;  %s240_s17 = int_to_ptr.vmem [resolvable:$true] %s239_s17 }
   0xb   :  { %256 = vrcp.f32 %v42_v11  ;;  %v299_v53 = vmov 0.7853982   ;;  %vm81_vm9 = vmand %vm79_vm7, %vm80_vm8  ;;  %v401_v59 = vshrl.u32 %v110_v56, 7  ;;  %v84_v61 = vand.u32 2147483648, %v343_v5  ;;  %s272_s18 = scalar_lea.vmem %s240_s17, 16  ;;  %s276_s19 = scalar_lea.vmem %s240_s17, 32 }
   0xc   :  { %258 = vrsqrt.f32 %v28_v46  ;;  %v78_v54 = vsel %vm66_vm1, 2.3561945, %v299_v53  ;;  %vm31_vm10 = vcmp.eq.f32.partialorder %v28_v46, inf  ;;  %v34_v0 = vand.u32 2147483648, %v28_v46  ;;  %p273_p0 = scmp.ne.s32.totalorder %s240_s17, %s272_s18  ;;  %p277_p1 = scmp.lt.s32.totalorder %s240_s17, %s240_s17 }
   0xd   :  { %127 = vperm.xlu1 %254, %v88_v7   ;;  %102 = vperm.xlu0 %253, %v88_v7   ;;  %vm33_vm11 = vcmp.eq.f32.partialorder %v28_v46, 0.0  ;;  %v136_v2 = vsub.s32 1, %v401_v59  ;;  %v112_v4 = vsub.s32 0, %v401_v59  ;;  %p278_p2 = scmp.lt.s32.totalorder %s276_s19, %s272_s18 }
   0xf   :  { %p279_p3 = por %p278_p2, %p277_p1 }
  0x11   :  { %131 = vperm.xlu1 %254, %v89_v10   ;;  %107 = vperm.xlu0 %253, %v89_v10   ;;  %p280_p4 = pnand %p279_p3, %p273_p0 }
  0x15   :  { %255 = vset.pattern.permute.xlu1 %v297_v3  ;;  %152 = vperm.xlu0 %253, %v146_v12   ;;  %v257_v19 = vpop.eup %256 }
  0x16   :  { %157 = vperm.xlu1 %255, %v147_v13   ;;  %v44_v22 = vmul.f32 %v257_v19, %v41_v18  ;;  %v259_v55 = vpop.eup %258 }
  0x17   :  { %v30_v58 = vmul.f32 %v259_v55, %v28_v46 }
  0x18   :  { %v45_v24 = vmul.f32 %v44_v22, %v44_v22 }
  0x19   :  { %162 = vperm.xlu0 %253, %v148_v14   ;;  %v32_v1 = vsel %vm31_vm10, %v28_v46, %v30_v58 }
  0x1a   :  { %167 = vperm.xlu1 %255, %v149_v15   ;;  %v46_v25 = vmul.f32 0.002785687, %v45_v24  ;;  %v35_v6 = vsel %vm33_vm11, %v34_v0, %v32_v1 }
  0x1b   :  { %v113_v10 = vrot.slane %v35_v6, %v112_v4 }
  0x1c   :  { %v47_v26 = vadd.f32 -0.015866, %v46_v25 }
  0x1d   :  { %184 = vperm.xlu0 %253, %v178_v16  }
  0x1e   :  { %189 = vperm.xlu1 %255, %v179_v17   ;;  %v48_v27 = vmul.f32 %v47_v26, %v45_v24 }
  0x20   :  { %v49_v28 = vadd.f32 0.04247222, %v48_v27 }
  0x21   :  { %194 = vperm.xlu0 %253, %v180_v20  }
  0x22   :  { %199 = vperm.xlu1 %255, %v181_v21   ;;  %v50_v29 = vmul.f32 %v49_v28, %v45_v24 }
  0x24   :  { %v51_v30 = vadd.f32 -0.074975304, %v50_v29 }
  0x25   :  { %218 = vperm.xlu0 %253, %v215_v23  }
  0x26   :  { %v52_v31 = vmul.f32 %v51_v30, %v45_v24 }
  0x28   :  { %v53_v32 = vadd.f32 0.1064488, %v52_v31 }
  0x2a   :  { %v54_v33 = vmul.f32 %v53_v32, %v45_v24 }
  0x2c   :  { %v55_v34 = vadd.f32 -0.14207031, %v54_v33 }
  0x2e   :  { %v56_v35 = vmul.f32 %v55_v34, %v45_v24 }
  0x30   :  { %v57_v36 = vadd.f32 0.19993454, %v56_v35 }
  0x32   :  { %v58_v37 = vmul.f32 %v57_v36, %v45_v24 }
  0x34   :  { %v59_v38 = vadd.f32 -0.33333147, %v58_v37 }
  0x36   :  { %v60_v39 = vmul.f32 %v59_v38, %v45_v24 }
  0x38   :  { %v61_v40 = vmul.f32 %v60_v39, %v44_v22 }
  0x3a   :  { %v62_v41 = vadd.f32 %v61_v40, %v44_v22 }
  0x3c   :  { %v64_v43 = vsub.f32 1.5707964, %v62_v41 }
  0x3e   :  { %v65_v45 = vsel %vm63_vm0, %v64_v43, %v62_v41 }
  0x3f   :  { %v67_v47 = vsub.f32 3.1415927, %v65_v45 }
  0x41   :  { %v68_v48 = vsel %vm66_vm1, %v67_v47, %v65_v45 }
  0x42   :  { %v72_v51 = vsel %vm71_vm3, %v70_v50, %v68_v48 }
  0x43   :  { %v76_v52 = vsel %vm75_vm6, nan, %v72_v51 }
  0x44   :  { %v82_v57 = vsel %vm81_vm9, %v78_v54, %v76_v52 }
  0x45   :  { %v83_v60 = vand.u32 2147483647, %v82_v57 }
  0x47   :  { %v85_v3 = vor.u32 %v84_v61, %v83_v60 }
  0x49   :  { %v137_v9 = vrot.slane %v85_v3, %v136_v2 }
  0x84   :  { %v120_v62 = vpop.permute.xlu1 %119  ;;  %v93_v63 = vpop.permute.xlu0 %92 }
  0x85   :  { %v138_v13 = vmul.f32 %v137_v9, %v120_v62  ;;  %v114_v14 = vmul.f32 %v113_v10, %v93_v63 }
  0x87   :  { %v142_v20 = vadd.f32 %v138_v13, %v114_v14 }
  0x88   :  { %v124_v7 = vpop.permute.xlu1 %123  ;;  %v98_v8 = vpop.permute.xlu0 %97 }
  0x89   :  { %v139_v5 = vmul.f32 %v137_v9, %v124_v7  ;;  %v115_v15 = vmul.f32 %v113_v10, %v98_v8 }
  0x8b   :  { %v143_v24 = vadd.f32 %v139_v5, %v115_v15 }
  0x8c   :  { %v128_v11 = vpop.permute.xlu1 %127  ;;  %v103_v12 = vpop.permute.xlu0 %102 }
  0x8d   :  { %v140_v18 = vmul.f32 %v137_v9, %v128_v11  ;;  %v116_v19 = vmul.f32 %v113_v10, %v103_v12 }
  0x8f   :  { %v144_v28 = vadd.f32 %v140_v18, %v116_v19 }
  0x90   :  { %v132_v16 = vpop.permute.xlu1 %131  ;;  %v108_v17 = vpop.permute.xlu0 %107 }
  0x91   :  { %v141_v21 = vmul.f32 %v137_v9, %v132_v16  ;;  %v117_v22 = vmul.f32 %v113_v10, %v108_v17 }
  0x93   :  { %v145_v30 = vadd.f32 %v141_v21, %v117_v22 }
  0x94   :  { %v153_v23 = vpop.permute.xlu0 %152 }
  0x95   :  { %v170_v25 = vadd.f32 %v153_v23, %v142_v20  ;;  %v158_v26 = vpop.permute.xlu1 %157 }
  0x96   :  { %v171_v27 = vadd.f32 %v158_v26, %v143_v24 }
  0x97   :  { %260 = vtanh.f32 %v170_v25 }
  0x98   :  { %262 = vtanh.f32 %v171_v27  ;;  %v163_v29 = vpop.permute.xlu0 %162 }
  0x99   :  { %v172_v31 = vadd.f32 %v163_v29, %v144_v28  ;;  %v168_v32 = vpop.permute.xlu1 %167 }
  0x9a   :  { %v173_v33 = vadd.f32 %v168_v32, %v145_v30 }
  0x9b   :  { %264 = vtanh.f32 %v172_v31 }
  0x9c   :  { %266 = vtanh.f32 %v173_v33  ;;  %v185_v34 = vpop.permute.xlu0 %184 }
  0x9d   :  { %v190_v35 = vpop.permute.xlu1 %189 }
  0xa0   :  { %v195_v42 = vpop.permute.xlu0 %194 }
  0xa1   :  { %v261_v36 = vpop.eup %260  ;;  %v200_v45 = vpop.permute.xlu1 %199 }
  0xa2   :  { %v263_v37 = vpop.eup %262  ;;  %v202_v38 = vmul.f32 %v261_v36, %v185_v34 }
  0xa3   :  { %v203_v39 = vmul.f32 %v263_v37, %v190_v35 }
  0xa4   :  { %v219_v53 = vpop.permute.xlu0 %218 }
  0xa5   :  { %v265_v40 = vpop.eup %264  ;;  %v206_v41 = vadd.f32 %v203_v39, %v202_v38  ;;  %v224_v56 = vrot.slane %v219_v53, %v112_v4 }
  0xa6   :  { %v267_v43 = vpop.eup %266  ;;  %v204_v44 = vmul.f32 %v265_v40, %v195_v42 }
  0xa7   :  { %v205_v46 = vmul.f32 %v267_v43, %v200_v45 }
  0xa8   :  { %v207_v47 = vadd.f32 %v206_v41, %v204_v44 }
  0xaa   :  { %v208_v48 = vadd.f32 %v207_v47, %v205_v46 }
  0xac   :  { %v209_v49 = vrot.slane %v208_v48, 4 }
  0xae   :  { %v210_v50 = vadd.f32 %v209_v49, %v208_v48 }
  0xb0   :  { %v211_v51 = vrot.slane %v210_v50, 2 }
  0xb2   :  { %v212_v52 = vadd.f32 %v211_v51, %v210_v50 }
  0xb4   :  { %v213_v54 = vrot.slane %v212_v52, 1 }
  0xb6   :  { %v214_v55 = vadd.f32 %v213_v54, %v212_v52 }
  0xb8   :  { %v225_v57 = vadd.f32 %v224_v56, %v214_v55 }
  0xba   :  { %v247_v58 = vmul.f32 -1.442695, %v225_v57 }
  0xbc   :  { %268 = vpow2.f32 %v247_v58 }
  0xc6   :  { %v269_v59 = vpop.eup %268 }
  0xc7   :  { %v229_v60 = vadd.f32 1.0, %v269_v59 }
  0xc9   :  { %270 = vrcp.f32 %v229_v60 }
  0xd3   :  { %v271_v61 = vpop.eup %270 }
  0xd4   :  { %232 = vst [vmem:[#allocation3] sm:$0x1] %v271_v61 }
  0xd5   :  { %283 = shalt.err (!%p280_p4)
}
  0xd6   :  { %s284_s22 = scalar_lea.hbm %s423_s5, 16 }
  0xd7   :  { %p285_p5 = scmp.ne.s32.totalorder %s423_s5, %s284_s22  ;;  %p288_p6 = scmp.lt.u32.totalorder %s284_s22, %s423_s5 }
  0xd9   :  { %p290_p7 = pnand %p288_p6, %p285_p5 }
  0xdb   :  { %293 = shalt.err (!%p290_p7)
}
  0xdc   :  { %242 = dma.vmem_to_hbm [thread:$0]  %s240_s17, 16, %s423_s5, [#allocation4]  }
  0xdd   :  { %294 = dma.done.wait [#allocation4], 16  }
  0xde   :  { %295 = vsyncadd [#allocation4], 4294967280 }
  0xdf   :  { %246 = vsyncpa [#allocation4], 1 }

</bundles_post_ra>
